<compile_context>
chip_gen: v5e
topology: v5e:2x2
jax: 0.10.0
libtpu: 0.0.40
codegen_flags: <defaults>
</compile_context>

<pallas_src>
import jax
import jax.numpy as jnp
from jax.experimental import pallas as pl
from jax.experimental.pallas import tpu as pltpu


def _maxpool3d_kernel(x_ref, o_ref):
    # x_ref: (TD, 2, TH, 2*W) — output-depth slabs, the 2 depth-window
    #        elements, output-height rows; the 2 height-window rows are the
    #        two contiguous W-wide halves of the lane dim.
    # o_ref: (TD, TH, Wo)     — fully pooled block (Wo = W // 2).
    TD, TH, Wo = o_ref.shape
    W = 2 * Wo

    # D- and H-pool straight from four quarter-slices of the ref (no
    # materialized full-width intermediate that would spill to VMEM).
    xd = jnp.maximum(
        jnp.maximum(x_ref[:, 0, :, :W], x_ref[:, 1, :, :W]),
        jnp.maximum(x_ref[:, 0, :, W:], x_ref[:, 1, :, W:]))          # (TD, TH, W)

    # W-pool: adjacent lane pairs, fused in-kernel via the group-reduce
    # pattern (split minor dim, reduce over the new size-2 minor axis).
    # Relayout/XLU cost is hidden under the HBM roofline for this kernel.
    o_ref[...] = jnp.max(xd.reshape(TD, TH, Wo, 2), axis=-1).astype(o_ref.dtype)


def _pick_tiles(Do, Ho, W, isz, budget):
    """Pick (TD, TH) for an input block of shape (TD, 2, TH, 2*W).

    TH is the second-minor dim of both blocks, so it must be a multiple of the
    sublane tile (or equal to the full Ho).  TD is unconstrained.  Ragged last
    blocks are allowed (cdiv grid), so sizes are driven by the VMEM budget,
    not by divisibility of Do / Ho.
    """
    sub = max(8, 32 // isz)                 # sublane multiple of the 2nd-minor dim
    th_unit = 2 * 2 * W * isz               # bytes per TH row at TD == 1
    if Ho <= sub or Ho * th_unit <= budget:
        TH = Ho
    else:
        TH = max(sub, min((Ho // sub) * sub, (budget // th_unit) // sub * sub))
    td_unit = 2 * TH * 2 * W * isz          # bytes per output-depth slab
    TD = max(1, min(Do, budget // td_unit))
    return TD, TH


@jax.jit
def downsample_max(x):
    """Equivalent of DownsampleMax()(x) with default down_par.

    x: (N, C, D, H, W) array (contiguous NCDHW).  Returns (N, C, D//2, H//2, W//2).
    """
    N, C, D, H, W = x.shape
    assert D % 2 == 0 and H % 2 == 0 and W % 2 == 0, "even spatial dims required"
    Do, Ho, Wo = D // 2, H // 2, W // 2
    NC = N * C
    isz = jnp.dtype(x.dtype).itemsize

    # Free view of the contiguous NCDHW buffer (no transpose, no copy):
    #   (NC, Do, 2, Ho, 2*W);  lanes [0:W] are h = 2*ho, lanes [W:2W] are h = 2*ho+1.
    xv = x.reshape(NC, Do, 2, Ho, 2 * W)

    # ~8 MiB input blocks: past the HBM-roofline knee on v5e/v6e/v7x; the
    # double-buffered footprint (2x in + 2x out ~ 2.25x block ~ 18 MiB) fits
    # v7x's 64 MiB physical VMEM with headroom once the scoped limit is raised.
    BLOCK_BUDGET = 8 << 20
    TD, TH = _pick_tiles(Do, Ho, W, isz, BLOCK_BUDGET)

    # v7x megacore: grid steps shard across the two TensorCores; avoid a tiny
    # odd step count (which would leave one core idle for the trailing step).
    if (NC * pl.cdiv(Do, TD) * pl.cdiv(Ho, TH)) % 2 == 1 and TD > 1:
        TD = (TD + 1) // 2

    grid = (NC, pl.cdiv(Do, TD), pl.cdiv(Ho, TH))

    in_block = TD * 2 * TH * 2 * W * isz
    out_block = TD * TH * Wo * isz
    # Raise the scoped-VMEM cap above the per-generation defaults (16/32 MiB);
    # grow it further only for pathologically wide volumes.
    vmem_limit = int(max(48 << 20, 2 * (in_block + out_block) + (2 << 20)))

    # TODO(synk): for small-W volumes (Wo < 128) the output minor dim is below
    # a full vreg lane width (masked vst); folding several Ho rows into the
    # lane dim would recover dense stores at the cost of extra in-kernel
    # minor-dim reshapes.  Writes are only 1/9 of HBM traffic here.
    out = pl.pallas_call(
        _maxpool3d_kernel,
        out_shape=jax.ShapeDtypeStruct((NC, Do, Ho, Wo), x.dtype),
        grid=grid,
        in_specs=[pl.BlockSpec((None, TD, 2, TH, 2 * W),
                               lambda nc, dt, ht: (nc, dt, 0, ht, 0))],
        out_specs=pl.BlockSpec((None, TD, TH, Wo),
                               lambda nc, dt, ht: (nc, dt, ht, 0)),
        compiler_params=pltpu.CompilerParams(
            dimension_semantics=("parallel", "parallel", "parallel"),
            vmem_limit_bytes=vmem_limit),
        cost_estimate=pl.CostEstimate(
            flops=int(7 * (x.size // 8)),
            transcendentals=0,
            bytes_accessed=int((x.size + x.size // 8) * isz)),
    )(xv)

    # Back to the PyTorch NCDHW convention (pure reshape of a contiguous
    # buffer, no transpose).
    return out.reshape(N, C, Do, Ho, Wo)


if __name__ == "__main__":
    key = jax.random.PRNGKey(0)
    N, C, D, H, W = 2, 4, 8, 16, 16
    x = jax.random.normal(key, (N, C, D, H, W), dtype=jnp.float32)

    y = jax.block_until_ready(downsample_max(x))

    # pure-JAX reference for MaxPool3d(kernel=2, stride=2, padding=0)
    ref = x.reshape(N, C, D // 2, 2, H // 2, 2, W // 2, 2).max(axis=(3, 5, 7))

    assert y.shape == ref.shape, (y.shape, ref.shape)
    assert jnp.allclose(y, ref), "mismatch vs reference max-pool"
    print("KERNEL_OK")
</pallas_src>

<mosaic_0001>
module attributes {stable_mosaic.version = 11 : i64} {
  func.func @_maxpool3d_kernel(%arg0: i32, %arg1: i32, %arg2: i32, %arg3: memref<1x4x2x8x32xf32, #tpu.memory_space<vmem>>, %arg4: memref<1x4x8x8xf32, #tpu.memory_space<vmem>>) attributes {dimension_semantics = [#tpu.dimension_semantics<parallel>, #tpu.dimension_semantics<parallel>, #tpu.dimension_semantics<parallel>], iteration_bounds = array<i64: 8, 1, 1>, scalar_prefetch = 0 : i64, scratch_operands = 0 : i64, tpu.core_type = #tpu.core_type<tc>, window_params = [{transform_indices = @transform_0, window_bounds = array<i64: 1, 4, 2, 8, 32>}, {transform_indices = @transform_1, window_bounds = array<i64: 1, 4, 8, 8>}]} {
    %c0 = arith.constant 0 : index
    %c0_0 = arith.constant 0 : index
    %c0_1 = arith.constant 0 : index
    %c0_2 = arith.constant 0 : index
    %c0_3 = arith.constant 0 : index
    %0 = vector.load %arg3[%c0, %c0_0, %c0_1, %c0_2, %c0_3] : memref<1x4x2x8x32xf32, #tpu.memory_space<vmem>>, vector<1x4x1x8x16xf32>
    %1 = vector.shape_cast %0 : vector<1x4x1x8x16xf32> to vector<4x8x16xf32>
    %c0_4 = arith.constant 0 : index
    %c0_5 = arith.constant 0 : index
    %c1 = arith.constant 1 : index
    %c0_6 = arith.constant 0 : index
    %c0_7 = arith.constant 0 : index
    %2 = vector.load %arg3[%c0_4, %c0_5, %c1, %c0_6, %c0_7] : memref<1x4x2x8x32xf32, #tpu.memory_space<vmem>>, vector<1x4x1x8x16xf32>
    %3 = vector.shape_cast %2 : vector<1x4x1x8x16xf32> to vector<4x8x16xf32>
    %4 = arith.maximumf %1, %3 : vector<4x8x16xf32>
    %c0_8 = arith.constant 0 : index
    %c0_9 = arith.constant 0 : index
    %c0_10 = arith.constant 0 : index
    %c0_11 = arith.constant 0 : index
    %c16 = arith.constant 16 : index
    %5 = vector.load %arg3[%c0_8, %c0_9, %c0_10, %c0_11, %c16] : memref<1x4x2x8x32xf32, #tpu.memory_space<vmem>>, vector<1x4x1x8x16xf32>
    %6 = vector.shape_cast %5 : vector<1x4x1x8x16xf32> to vector<4x8x16xf32>
    %c0_12 = arith.constant 0 : index
    %c0_13 = arith.constant 0 : index
    %c1_14 = arith.constant 1 : index
    %c0_15 = arith.constant 0 : index
    %c16_16 = arith.constant 16 : index
    %7 = vector.load %arg3[%c0_12, %c0_13, %c1_14, %c0_15, %c16_16] : memref<1x4x2x8x32xf32, #tpu.memory_space<vmem>>, vector<1x4x1x8x16xf32>
    %8 = vector.shape_cast %7 : vector<1x4x1x8x16xf32> to vector<4x8x16xf32>
    %9 = arith.maximumf %6, %8 : vector<4x8x16xf32>
    %10 = arith.maximumf %4, %9 : vector<4x8x16xf32>
    %11 = vector.shape_cast %10 : vector<4x8x16xf32> to vector<4x8x8x2xf32>
    %cst = arith.constant dense<0xFF800000> : vector<4x8x8xf32>
    %12 = vector.multi_reduction <maximumf>, %11, %cst [3] : vector<4x8x8x2xf32> to vector<4x8x8xf32>
    %c0_17 = arith.constant 0 : index
    %c0_18 = arith.constant 0 : index
    %c0_19 = arith.constant 0 : index
    %c0_20 = arith.constant 0 : index
    %13 = vector.load %arg4[%c0_17, %c0_18, %c0_19, %c0_20] : memref<1x4x8x8xf32, #tpu.memory_space<vmem>>, vector<1x4x8x8xf32>
    %14 = vector.shape_cast %13 : vector<1x4x8x8xf32> to vector<4x8x8xf32>
    %15 = vector.shape_cast %12 : vector<4x8x8xf32> to vector<1x4x8x8xf32>
    tpu.vector_store %arg4[%c0_17, %c0_18, %c0_19, %c0_20], %15 {strides = array<i32>} : memref<1x4x8x8xf32, #tpu.memory_space<vmem>>, vector<1x4x8x8xf32>,
    return
  }
  func.func @transform_0(%arg0: i32, %arg1: i32, %arg2: i32) -> (i32, i32, i32, i32, i32) {
    %c0_i32 = arith.constant 0 : i32
    %c0_i32_0 = arith.constant 0 : i32
    %c0_i32_1 = arith.constant 0 : i32
    return %arg0, %arg1, %c0_i32, %arg2, %c0_i32_0 : i32, i32, i32, i32, i32
  }
  func.func @transform_1(%arg0: i32, %arg1: i32, %arg2: i32) -> (i32, i32, i32, i32) {
    %c0_i32 = arith.constant 0 : i32
    %c0_i32_0 = arith.constant 0 : i32
    return %arg0, %arg1, %arg2, %c0_i32 : i32, i32, i32, i32
  }
}

</mosaic_0001>

<bundles_post_ra>
// kernel: downsample_max.1
= control target key start
LH: loop header
LB: loop body
LE: loop exit
PB: predicated region body
PF: predicated region fallthrough
CT: control target
= control target key end

     0   :  { %6 = vsyncpa [#allocation3], 0  ;;  %s1892_s0 = inlined_call_operand.vmem [shape: f32[8,4,2,8,32], index: 0, kind: input, shape index: {}]   ;;  %s1893_s1 = inlined_call_operand.hbm [shape: f32[8,4,8,8], index: 1, kind: output, shape index: {}]  }
   0x1   :  { %8 = vsyncpa [#allocation3 + $0x1], 0  ;;  %s1242_s6 = smov 0   ;;  %s1244_s7 = smov 0  }
   0x2   :  { %s1246_s8 = smov 0   ;;  %s1248_s9 = smov 0  }
   0x3   :  { %s1250_s10 = smov 0   ;;  %s1252_s11 = smov 0  }
   0x4 LB: > { %s1054_s12 = sadd.s32 4294967295, %s1218_s11   ;;  %s1055_s13 = sadd.s32 4294967294, %s1218_s11   ;;  %s1218_s11 = sphi %s1252_s11, %s14_s11   ;;  %s1214_s10 = sphi %s1250_s10, %s1900_s10   ;;  %s1210_s9 = sphi %s1248_s9, %s1899_s9   ;;  %s1206_s8 = sphi %s1246_s8, %s1898_s8   ;;  %s1202_s7 = sphi %s1244_s7, %s1897_s7   ;;  %s1198_s6 = sphi %s1242_s6, %s1896_s6  }
   0x5   : > { %s33_s14 = sadd.s32 1, %s1214_s10  ;;  %s74_s15 = sadd.s32 1, %s1206_s8 }
   0x6   : > { %p35_p0 = scmp.ge.s32.totalorder %s33_s14, 8  ;;  %p84_p1 = scmp.ne.s32.totalorder %s1206_s8, %s1202_s7 }
   0x7   : > { %p85_p2 = scmp.eq.s32.totalorder %s1054_s12, 7  ;;  %p90_p3 = scmp.ne.s32.totalorder %s1202_s7, %s1198_s6 }
   0x8   : > { %s1902_s14 = smov (%p35_p0, %s33_s14), 0  ;;  %p91_p5 = scmp.eq.s32.totalorder %s1055_s13, 7 }
   0x9   : > { %p1282_p4 = por %p85_p2, %p84_p1  ;;  %s67_s17 = ssub.s32 %s1214_s10, %s1902_s14 }
   0xa   : > { %p1058_p6 = scmp.ge.s32.totalorder %s1218_s11, 1  ;;  %p72_p7 = scmp.eq.s32.totalorder %s67_s17, 0 }
   0xb   : > { %p1289_p8 = por %p91_p5, %p90_p3  ;;  %p126_p9 = scmp.lt.s32.totalorder %s1218_s11, 9 }
   0xc   : > { %s1295_s19 = scalar_select %p72_p7, %s1206_s8, %s74_s15  }
   0xd   : > { %p127_p10 = pnand %p1058_p6, %p126_p9 }
   0xe   : > { %p155_p11 = scmp.lt.s32.totalorder (!%p127_p10), %s1210_s9, 7  ;;  %s1220_s25 = smov (!%p127_p10), 112  }
   0xf   : > { %130 = sbr.rel (%p127_p10) target bundleno = 542 (0x21e), region = 24  ;;  %s1221_s26 = smov (!%p127_p10), 126  }
  0x10   : > { %s1222_s27 = smov (!%p127_p10), 124   ;;  %s1223_s28 = smov (!%p127_p10), 122  }
  0x11   : > { %s1224_s29 = smov (!%p127_p10), 120   ;;  %s1225_s30 = smov (!%p127_p10), 118  }
  0x12   : > { %s1226_s2 = smov (!%p127_p10), 116   ;;  %s1227_s3 = smov (!%p127_p10), 114  }
  0x13   : > { %s151_s4 = sand.u32 (!%p127_p10), 1, %s1202_s7   ;;  %s1072_s13 = sshll.u32 (!%p127_p10), %s1210_s9, 5 }
  0x14   : > { %s156_s20 = scalar_select %p155_p11, %s1210_s9, 7  ;;  %v1228_v25 = vmov 1983009808   ;;  %vm291_vm0 = vcmask 1047556   ;;  %vm739_vm1 = vcmask 15360   ;;  %vm902_vm2 = vcmask 1041409  }
  0x15   : > { %v296_v26 = vunpack.c.l.s4 %v1228_v25  ;;  %vm904_vm3 = vcmask 1042434   ;;  %vm906_vm4 = vcmask 1043459   ;;  %vm908_vm5 = vcmask 1044484   ;;  %s1059_s5 = sshll.u32 %s151_s4, 5  ;;  %s961_s9 = scalar_lea.hbm %s1893_s1, %s1072_s13 }
  0x16   : > { %s1071_s21 = sshll.u32 %s156_s20, 6  ;;  %vm910_vm6 = vcmask 1045509   ;;  %vm912_vm7 = vcmask 1046534   ;;  %vm914_vm8 = vcmask 1047559   ;;  %vm941_vm9 = vcmask 64512   ;;  %s1799_s12 = scalar_lea.vmem [#allocation2], %s1059_s5 }
  0x17   : > { %s166_s24 = scalar_lea.vmem %s1892_s0, %s1071_s21  ;;  %v1347_v33 = vunpack.c.0.s8 %v296_v26  ;;  %s962_s20 = sshll.u32 %s1799_s12, 4  ;;  %s963_s20 = int_to_ptr.vmem [resolvable:$true] %s962_s20 }
  0x18   : > { %v171_v0 = vld [vmem:[%s166_s24 + $0x20] sm:$0xff]  ;;  %v1064_v1 = vld [vmem:[%s166_s24 + $0x28] sm:$0xff]  ;;  %v172_v6 = vld [vmem:[%s166_s24 + $0x30] sm:$0xff]  ;;  %s964_s21 = sshll.u32 %s961_s9, 4  ;;  %s947_s22 = scalar_lea.sflag [#allocation3], %s151_s4  ;;  %s965_s21 = int_to_ptr.hbm [resolvable:$true] %s964_s21 }
  0x19   : > { %v169_v2 = vld [vmem:[%s166_s24] sm:$0xff]  ;;  %v180_v3 = vmax.f32 %v171_v0, %v1064_v1  ;;  %v1062_v4 = vld [vmem:[%s166_s24 + $0x8] sm:$0xff]  ;;  %v1065_v7 = vld [vmem:[%s166_s24 + $0x38] sm:$0xff]  ;;  %s1154_s23 = sshra.s32 %s965_s21, 4  ;;  %s1155_s23 = int_to_ptr.hbm [resolvable:$true] %s1154_s23 }
  0x1a   : > { %v178_v5 = vmax.f32 %v169_v2, %v1062_v4  ;;  %v170_v8 = vld [vmem:[%s166_s24 + $0x10] sm:$0xff]  ;;  %v1063_v9 = vld [vmem:[%s166_s24 + $0x18] sm:$0xff]  ;;  %v181_v10 = vmax.f32 %v172_v6, %v1065_v7  ;;  %s1156_s24 = scalar_lea.hbm %s1155_s23, 32  ;;  %p1161_p1 = scmp.lt.s32.totalorder %s1155_s23, %s1893_s1 }
  0x1b   : > { %190 = vrot.lane.b32.xlu1 %v180_v3, %s1220_s25  ;;  %v179_v11 = vmax.f32 %v170_v8, %v1063_v9  ;;  %p1157_p12 = scmp.ne.s32.totalorder %s1155_s23, %s1156_s24 }
  0x1c   : > { %186 = vrot.lane.b32.xlu0 %v178_v5, %s1220_s25 }
  0x1d   : > { %p1158_p13 = pnand %p1157_p12, %p1282_p4 }
  0x1f   : > { %p1159_p0 = pneg %p1158_p13 }
  0x23   : > { %192 = vrot.lane.b32.xlu1 %v181_v10, %s1220_s25 }
  0x24   : > { %188 = vrot.lane.b32.xlu0 %v179_v11, %s1220_s25 }
  0x8d   : > { %v191_v12 = vpop.permute.xlu1 %190 }
  0x8e   : > { %v1302_v13 = vmax.f32 %v180_v3, %v191_v12  ;;  %v187_v14 = vpop.permute.xlu0 %186 }
  0x8f   : > { %v1304_v15 = vmax.f32 %v178_v5, %v187_v14 }
  0x90   : > { %210 = vrot.lane.b32.xlu0 %v1302_v13, %s1221_s26  ;;  %v517_v36 = vrot.slane %v1302_v13, 4 }
  0x91   : > { %206 = vrot.lane.b32.xlu2 %v1304_v15, %s1221_s26 }
  0x95   : > { %v193_v16 = vpop.permute.xlu1 %192 }
  0x96   : > { %v1308_v17 = vmax.f32 %v181_v10, %v193_v16  ;;  %v189_v18 = vpop.permute.xlu0 %188 }
  0x97   : > { %v1310_v19 = vmax.f32 %v179_v11, %v189_v18 }
  0x98   : > { %212 = vrot.lane.b32.xlu1 %v1308_v17, %s1221_s26  ;;  %v629_v60 = vrot.slane %v1308_v17, 4 }
  0x99   : > { %220 = vrot.lane.b32.xlu0 %v1310_v19, %s1222_s27  ;;  %208 = vrot.lane.b32.xlu2 %v1310_v19, %s1221_s26 }
  0xa0   : > { %222 = vrot.lane.b32.xlu1 %v1302_v13, %s1222_s27 }
  0xa1   : > { %230 = vrot.lane.b32.xlu0 %v1304_v15, %s1223_s28  ;;  %218 = vrot.lane.b32.xlu2 %v1304_v15, %s1222_s27 }
  0xa8   : > { %232 = vrot.lane.b32.xlu1 %v1310_v19, %s1223_s28 }
  0xa9   : > { %236 = vrot.lane.b32.xlu0 %v1308_v17, %s1223_s28  ;;  %224 = vrot.lane.b32.xlu2 %v1308_v17, %s1222_s27  ;;  %s1160_s27 = scalar_lea.hbm %s1893_s1, 256 }
  0xaa   : > { %p1162_p2 = scmp.lt.s32.totalorder %s1160_s27, %s1156_s24 }
  0xac   : > { %p1163_p3 = por %p1162_p2, %p1161_p1 }
  0xae   : > { %p1164_p5 = pnand %p1163_p3, %p1159_p0 }
  0xb0   : > { %242 = vrot.lane.b32.xlu1 %v1304_v15, %s1224_s29 }
  0xb1   : > { %246 = vrot.lane.b32.xlu0 %v1302_v13, %s1224_s29  ;;  %234 = vrot.lane.b32.xlu2 %v1302_v13, %s1223_s28 }
  0xb8   : > { %248 = vrot.lane.b32.xlu1 %v1308_v17, %s1224_s29 }
  0xb9   : > { %256 = vrot.lane.b32.xlu0 %v1310_v19, %s1225_s30  ;;  %244 = vrot.lane.b32.xlu2 %v1310_v19, %s1224_s29 }
  0xc0   : > { %258 = vrot.lane.b32.xlu1 %v1302_v13, %s1225_s30 }
  0xc1   : > { %266 = vrot.lane.b32.xlu0 %v1304_v15, %s1226_s2  ;;  %254 = vrot.lane.b32.xlu2 %v1304_v15, %s1225_s30 }
  0xc8   : > { %268 = vrot.lane.b32.xlu1 %v1310_v19, %s1226_s2 }
  0xc9   : > { %272 = vrot.lane.b32.xlu0 %v1308_v17, %s1226_s2  ;;  %260 = vrot.lane.b32.xlu2 %v1308_v17, %s1225_s30 }
  0xd0   : > { %278 = vrot.lane.b32.xlu1 %v1304_v15, %s1227_s3 }
  0xd1   : > { %282 = vrot.lane.b32.xlu0 %v1302_v13, %s1227_s3  ;;  %270 = vrot.lane.b32.xlu2 %v1302_v13, %s1226_s2 }
  0xd8   : > { %284 = vrot.lane.b32.xlu1 %v1308_v17, %s1227_s3 }
  0xd9   : > { %280 = vrot.lane.b32.xlu2 %v1310_v19, %s1227_s3 }
  0xeb   : > { %v1338_v20 = vpop.permute.xlu2 %206 }
  0xec   : > { %v305_v18 = vrot.slane %v1338_v20, 4 }
  0xf3   : > { %v1340_v21 = vpop.permute.xlu2 %208 }
  0xfb   : > { %v1342_v22 = vpop.permute.xlu2 %218 }
 0x102   : > { %v211_v23 = vpop.permute.xlu0 %210 }
 0x103   : > { %v225_v24 = vpop.permute.xlu2 %224  ;;  %v529_v27 = vrot.slane %v211_v23, 4 }
 0x104   : > { %v627_v45 = vrot.slane %v225_v24, 4  ;;  %v630_v1 = vsel %vm291_vm0, %v225_v24, %v629_v60  ;;  %v290_v24 = vrot.slane %v1342_v22, 4 }
 0x105   : > { %v638_v5 = vperm.slane %v630_v1, %v1347_v33 }
 0x106   : > { %v628_v54 = vsel %vm291_vm0, %v627_v45, %v1308_v17 }
 0x107   : > { %v634_v61 = vperm.slane %v628_v54, %v1347_v33 }
 0x109   : > { %v677_v4 = vrot.slane %v634_v61, 4 }
 0x10a   : > { %v213_v28 = vpop.permute.xlu1 %212 }
 0x10b   : > { %v235_v29 = vpop.permute.xlu2 %234  ;;  %v1344_v30 = vpop.permute.xlu0 %220  ;;  %v641_v55 = vrot.slane %v213_v28, 4 }
 0x10c   : > { %v527_v31 = vrot.slane %v235_v29, 4  ;;  %v530_v32 = vsel %vm291_vm0, %v235_v29, %v529_v27 }
 0x10d   : > { %v538_v35 = vperm.slane %v530_v32, %v1347_v33 }
 0x10e   : > { %v528_v34 = vsel %vm291_vm0, %v527_v31, %v211_v23  ;;  %v293_v23 = vrot.slane %v1304_v15, 4 }
 0x10f   : > { %v534_v37 = vperm.slane %v528_v34, %v1347_v33  ;;  %v575_v43 = vrot.slane %v538_v35, 4 }
 0x110   : > { %v294_v25 = vsel %vm291_vm0, %v1342_v22, %v293_v23  ;;  %v292_v22 = vsel %vm291_vm0, %v290_v24, %v1304_v15 }
 0x111   : > { %v563_v47 = vrot.slane %v534_v37, 4  ;;  %v298_v15 = vperm.slane %v292_v22, %v1347_v33 }
 0x112   : > { %v223_v38 = vpop.permute.xlu1 %222 }
 0x113   : > { %v515_v39 = vrot.slane %v223_v38, 4  ;;  %v518_v40 = vsel %vm291_vm0, %v223_v38, %v517_v36  ;;  %v1354_v41 = vpop.permute.xlu2 %244  ;;  %v231_v42 = vpop.permute.xlu0 %230  ;;  %v403_v38 = vrot.slane %v1344_v30, 4 }
 0x114   : > { %v526_v44 = vperm.slane %v518_v40, %v1347_v33  ;;  %v303_v16 = vrot.slane %v231_v42, 4  ;;  %v306_v26 = vsel %vm291_vm0, %v231_v42, %v305_v18 }
 0x115   : > { %v516_v46 = vsel %vm291_vm0, %v515_v39, %v1302_v13  ;;  %v689_v13 = vrot.slane %v638_v5, 4  ;;  %v417_v39 = vrot.slane %v1340_v21, 4 }
 0x116   : > { %v522_v48 = vperm.slane %v516_v46, %v1347_v33  ;;  %v577_v49 = vrot.slane %v526_v44, 4  ;;  %v1361_v50 = vsel %vm291_vm0, %v575_v43, %v526_v44  ;;  %v304_v29 = vsel %vm291_vm0, %v303_v16, %v1338_v20 }
 0x117   : > { %v314_v20 = vperm.slane %v306_v26, %v1347_v33  ;;  %v310_v42 = vperm.slane %v304_v29, %v1347_v33  ;;  %v1229_v43 = vmov 1934713408  }
 0x118   : > { %v565_v51 = vrot.slane %v522_v48, 4  ;;  %v1364_v52 = vsel %vm291_vm0, %v563_v47, %v522_v48  ;;  %v1367_v53 = vsel %vm291_vm0, %v538_v35, %v577_v49  ;;  %v405_v35 = vrot.slane %v1310_v19, 4 }
 0x119   : > { %v344_v44 = vunpack.c.l.s4 %v1229_v43  ;;  %v404_v48 = vsel %vm291_vm0, %v403_v38, %v1310_v19  ;;  %v339_v54 = vrot.slane %v310_v42, 4 }
 0x11a   : > { %v233_v56 = vpop.permute.xlu1 %232  ;;  %v1372_v57 = vsel %vm291_vm0, %v534_v37, %v565_v51  ;;  %v302_v37 = vperm.slane %v294_v25, %v1347_v33  ;;  %v406_v40 = vsel %vm291_vm0, %v1344_v30, %v405_v35  ;;  %v351_v51 = vrot.slane %v314_v20, 4 }
 0x11b   : > { %v1374_v58 = vpop.permute.xlu2 %254  ;;  %v237_v59 = vpop.permute.xlu0 %236  ;;  %v415_v31 = vrot.slane %v233_v56, 4  ;;  %v418_v46 = vsel %vm291_vm0, %v233_v56, %v417_v39  ;;  %v414_v49 = vperm.slane %v406_v40, %v1347_v33  ;;  %v341_v56 = vrot.slane %v298_v15, 4 }
 0x11c   : > { %v639_v62 = vrot.slane %v237_v59, 4  ;;  %v642_v63 = vsel %vm291_vm0, %v237_v59, %v641_v55  ;;  %v353_v47 = vrot.slane %v302_v37, 4  ;;  %v1441_v59 = vunpack.c.0.s8 %v344_v44 }
 0x11d   : > { %v650_v0 = vperm.slane %v642_v63, %v1347_v33  ;;  %v416_v45 = vsel %vm291_vm0, %v415_v31, %v1340_v21  ;;  %v426_v60 = vperm.slane %v418_v46, %v1347_v33  ;;  %v465_v63 = vrot.slane %v414_v49, 4 }
 0x11e   : > { %v640_v2 = vsel %vm291_vm0, %v639_v62, %v213_v28  ;;  %v422_v30 = vperm.slane %v416_v45, %v1347_v33  ;;  %v354_v21 = vsel %vm291_vm0, %v314_v20, %v353_v47  ;;  %v410_v62 = vperm.slane %v404_v48, %v1347_v33 }
 0x11f   : > { %v646_v3 = vperm.slane %v640_v2, %v1347_v33  ;;  %v687_v7 = vrot.slane %v650_v0, 4  ;;  %v1400_v17 = vsel %vm291_vm0, %v650_v0, %v689_v13  ;;  %v352_v19 = vsel %vm291_vm0, %v351_v51, %v302_v37 }
 0x120   : > { %v451_v0 = vrot.slane %v422_v30, 4  ;;  %v1448_v1 = vperm.slane %v354_v21, %v1441_v59  ;;  %v342_v2 = vsel %vm291_vm0, %v310_v42, %v341_v56  ;;  %v1455_v13 = vperm.slane %v352_v19, %v1441_v59 }
 0x121   : > { %v675_v6 = vrot.slane %v646_v3, 4  ;;  %v1387_v9 = vsel %vm291_vm0, %v646_v3, %v677_v4  ;;  %v1397_v14 = vsel %vm291_vm0, %v687_v7, %v638_v5  ;;  %v340_v3 = vsel %vm291_vm0, %v339_v54, %v298_v15 }
 0x122   : > { %v1384_v8 = vpop.permute.xlu1 %242  ;;  %v466_v4 = vsel %vm291_vm0, %v426_v60, %v465_v63  ;;  %v453_v5 = vrot.slane %v410_v62, 4  ;;  %v1459_v16 = vperm.slane %v1361_v50, %v1441_v59  ;;  %v463_v18 = vrot.slane %v426_v60, 4 }
 0x123   : > { %v1389_v10 = vpop.permute.xlu2 %260  ;;  %v1391_v11 = vpop.permute.xlu0 %246  ;;  %v1394_v12 = vsel %vm291_vm0, %v675_v6, %v634_v61  ;;  %v429_v6 = vrot.slane %v1354_v41, 4  ;;  %v1463_v24 = vperm.slane %v342_v2, %v1441_v59  ;;  %v1466_v25 = vperm.slane %v340_v3, %v1441_v59 }
 0x124   : > { %v541_v27 = vrot.slane %v1391_v11, 4  ;;  %v317_v26 = vrot.slane %v1384_v8, 4  ;;  %v1470_v29 = vperm.slane %v466_v4, %v1441_v59  ;;  %v401_v31 = vrot.slane %v1448_v1, 4 }
 0x125   : > { %v452_v50 = vsel %vm291_vm0, %v451_v0, %v410_v62  ;;  %v329_v20 = vrot.slane %v1374_v58, 4  ;;  %v397_v42 = vrot.slane %v1455_v13, 4  ;;  %v454_v43 = vsel %vm291_vm0, %v422_v30, %v453_v5 }
 0x126   : > { %v389_v45 = vrot.slane %v1466_v25, 4  ;;  %v393_v15 = vrot.slane %v1463_v24, 4  ;;  %v1486_v46 = vsel %vm291_vm0, %v463_v18, %v414_v49  ;;  %v513_v51 = vrot.slane %v1470_v29, 4 }
 0x127   : > { %v1494_v54 = vperm.slane %v452_v50, %v1441_v59  ;;  %v1501_v49 = vperm.slane %v454_v43, %v1441_v59  ;;  %v1509_v62 = vperm.slane %v1372_v57, %v1441_v59  ;;  %v1523_v57 = vperm.slane %v1387_v9, %v1441_v59 }
 0x129   : > { %v501_v3 = vrot.slane %v1494_v54, 4 }
 0x12a   : > { %v1409_v28 = vpop.permute.xlu1 %248 }
 0x12b   : > { %v1413_v32 = vpop.permute.xlu2 %270  ;;  %v1415_v34 = vpop.permute.xlu0 %256  ;;  %v653_v63 = vrot.slane %v1409_v28, 4 }
 0x12c   : > { %v1420_v36 = vsel %vm291_vm0, %v1413_v32, %v541_v27  ;;  %v441_v23 = vrot.slane %v1415_v34, 4  ;;  %v539_v60 = vrot.slane %v1413_v32, 4 }
 0x12e   : > { %v540_v18 = vsel %vm291_vm0, %v539_v60, %v1391_v11 }
 0x132   : > { %v1439_v55 = vpop.permute.xlu1 %258 }
 0x133   : > { %v267_v61 = vpop.permute.xlu0 %266  ;;  %v281_v7 = vpop.permute.xlu2 %280 }
 0x134   : > { %v439_v35 = vrot.slane %v281_v7, 4  ;;  %v442_v22 = vsel %vm291_vm0, %v281_v7, %v441_v23  ;;  %v315_v37 = vrot.slane %v267_v61, 4  ;;  %v318_v44 = vsel %vm291_vm0, %v267_v61, %v317_v26 }
 0x135   : > { %v1489_v47 = vperm.slane %v442_v22, %v1347_v33  ;;  %v326_v61 = vperm.slane %v318_v44, %v1347_v33  ;;  %v617_v22 = vrot.slane %v1509_v62, 4  ;;  %v1544_v44 = vperm.slane %v540_v18, %v1347_v33 }
 0x136   : > { %v440_v30 = vsel %vm291_vm0, %v439_v35, %v1415_v34  ;;  %v316_v21 = vsel %vm291_vm0, %v315_v37, %v1384_v8  ;;  %v665_v34 = vrot.slane %v1389_v10, 4 }
 0x137   : > { %v1517_v0 = vperm.slane %v440_v30, %v1347_v33  ;;  %v322_v32 = vperm.slane %v316_v21, %v1347_v33  ;;  %v377_v23 = vrot.slane %v326_v61, 4 }
 0x139   : > { %v365_v37 = vrot.slane %v322_v32, 4 }
 0x13a   : > { %v269_v27 = vpop.permute.xlu1 %268 }
 0x13b   : > { %v430_v38 = vsel %vm291_vm0, %v269_v27, %v429_v6  ;;  %v273_v40 = vpop.permute.xlu0 %272  ;;  %v427_v8 = vrot.slane %v269_v27, 4 }
 0x13c   : > { %v1478_v39 = vperm.slane %v430_v38, %v1347_v33  ;;  %v654_v4 = vsel %vm291_vm0, %v273_v40, %v653_v63  ;;  %v651_v50 = vrot.slane %v273_v40, 4  ;;  %v475_v40 = vrot.slane %v1517_v0, 4 }
 0x13d   : > { %v428_v9 = vsel %vm291_vm0, %v427_v8, %v1354_v41  ;;  %v1539_v38 = vperm.slane %v654_v4, %v1347_v33  ;;  %v553_v41 = vrot.slane %v1439_v55, 4 }
 0x13e   : > { %v489_v48 = vrot.slane %v1478_v39, 4  ;;  %v652_v60 = vsel %vm291_vm0, %v651_v50, %v1409_v28 }
 0x140   : > { %v490_v56 = vsel %vm291_vm0, %v1489_v47, %v489_v48  ;;  %v1550_v48 = vperm.slane %v428_v9, %v1347_v33 }
 0x141   : > { %v1514_v19 = vperm.slane %v490_v56, %v1441_v59 }
 0x142   : > { %v279_v2 = vpop.permute.xlu1 %278  ;;  %v476_v50 = vsel %vm291_vm0, %v475_v40, %v1550_v48 }
 0x143   : > { %v327_v5 = vrot.slane %v279_v2, 4  ;;  %v330_v6 = vsel %vm291_vm0, %v279_v2, %v329_v20  ;;  %v514_v7 = vsel %vm291_vm0, %v1514_v19, %v513_v51  ;;  %v283_v20 = vpop.permute.xlu0 %282  ;;  %v713_v2 = vrot.slane %v1539_v38, 4 }
 0x144   : > { %v338_v26 = vperm.slane %v330_v6, %v1347_v33  ;;  %v785_v27 = vsel %vm739_vm1, %v514_v7, -inf  ;;  %v554_v56 = vsel %vm291_vm0, %v283_v20, %v553_v41  ;;  %v551_v4 = vrot.slane %v283_v20, 4 }
 0x145   : > { %v328_v35 = vsel %vm291_vm0, %v327_v5, %v1374_v58  ;;  %786 = vmax.xlane.f32.xlu1 %v785_v27  ;;  %v1566_v27 = vperm.slane %v554_v56, %v1347_v33  ;;  %v482_v40 = vperm.slane %v476_v50, %v1441_v59 }
 0x146   : > { %v334_v11 = vperm.slane %v328_v35, %v1347_v33  ;;  %v378_v43 = vsel %vm291_vm0, %v338_v26, %v377_v23  ;;  %v375_v30 = vrot.slane %v338_v26, 4 }
 0x147   : > { %v386_v58 = vperm.slane %v378_v43, %v1441_v59 }
 0x148   : > { %v363_v51 = vrot.slane %v334_v11, 4  ;;  %v366_v21 = vsel %vm291_vm0, %v334_v11, %v365_v37  ;;  %v376_v9 = vsel %vm291_vm0, %v375_v30, %v326_v61  ;;  %v1582_v11 = vperm.slane %v652_v60, %v1347_v33 }
 0x149   : > { %v402_v63 = vsel %vm291_vm0, %v386_v58, %v401_v31  ;;  %v374_v8 = vperm.slane %v366_v21, %v1441_v59  ;;  %v552_v61 = vsel %vm291_vm0, %v551_v4, %v1439_v55  ;;  %v1600_v55 = vperm.slane %v376_v9, %v1441_v59 }
 0x14a   : > { %v285_v5 = vpop.permute.xlu1 %284  ;;  %v761_v6 = vsel %vm739_vm1, %v402_v63, -inf  ;;  %v364_v7 = vsel %vm291_vm0, %v363_v51, %v322_v32  ;;  %v487_v51 = vrot.slane %v1489_v47, 4  ;;  %v1604_v21 = vperm.slane %v1397_v14, %v1441_v59 }
 0x14b   : > { %v663_v18 = vrot.slane %v285_v5, 4  ;;  %v666_v23 = vsel %vm291_vm0, %v285_v5, %v665_v34  ;;  %762 = vmax.xlane.f32.xlu2 %v761_v6  ;;  %v391_v28 = vrot.slane %v374_v8, 4  ;;  %v370_v26 = vperm.slane %v364_v7, %v1441_v59 }
 0x14c   : > { %v1569_v31 = vperm.slane %v666_v23, %v1347_v33  ;;  %v1607_v60 = vperm.slane %v552_v61, %v1347_v33  ;;  %v621_v47 = vrot.slane %v1459_v16, 4  ;;  %v488_v56 = vsel %vm291_vm0, %v487_v51, %v1478_v39 }
 0x14d   : > { %v664_v32 = vsel %vm291_vm0, %v663_v18, %v1389_v10  ;;  %v392_v34 = vsel %vm291_vm0, %v391_v28, %v1463_v24  ;;  %v390_v35 = vsel %vm291_vm0, %v370_v26, %v389_v45  ;;  %v387_v37 = vrot.slane %v370_v26, 4 }
 0x14e   : > { %v1588_v20 = vsel %vm291_vm0, %v1569_v31, %v713_v2  ;;  %v746_v10 = vsel %vm739_vm1, %v392_v34, -inf  ;;  %v743_v43 = vsel %vm739_vm1, %v390_v35, -inf  ;;  %v399_v45 = vrot.slane %v386_v58, 4 }
 0x14f   : > { %747 = vmax.xlane.f32.xlu1 %v746_v10  ;;  %v388_v41 = vsel %vm291_vm0, %v387_v37, %v1466_v25  ;;  %v1597_v30 = vperm.slane %v664_v32, %v1347_v33  ;;  %744 = vmax.xlane.f32.xlu0 %v743_v43  ;;  %v599_v25 = vrot.slane %v1566_v27, 4  ;;  %v1612_v58 = vperm.slane %v1367_v53, %v1441_v59 }
 0x150   : > { %v701_v63 = vrot.slane %v1582_v11, 4  ;;  %v740_v2 = vsel %vm739_vm1, %v388_v41, -inf  ;;  %v729_v14 = vrot.slane %v1523_v57, 4  ;;  %v550_v4 = vperm.slane %v1420_v36, %v1347_v33 }
 0x151   : > { %v589_v5 = vrot.slane %v1544_v44, 4  ;;  %v400_v53 = vsel %vm291_vm0, %v399_v45, %v1448_v1  ;;  %v499_v6 = vrot.slane %v482_v40, 4  ;;  %v398_v39 = vsel %vm291_vm0, %v1600_v55, %v397_v42 }
 0x152   : > { %v702_v7 = vsel %vm291_vm0, %v1597_v30, %v701_v63  ;;  %v733_v18 = vrot.slane %v1604_v21, 4  ;;  %v698_v33 = vperm.slane %v1400_v17, %v1441_v59  ;;  %v477_v36 = vrot.slane %v1550_v48, 4 }
 0x153   : > { %741 = vmax.xlane.f32.xlu2 %v740_v2  ;;  %v1636_v23 = vperm.slane %v488_v56, %v1441_v59  ;;  %v600_v1 = vsel %vm291_vm0, %v599_v25, %v550_v4  ;;  %v590_v28 = vsel %vm291_vm0, %v1607_v60, %v589_v5  ;;  %v711_v42 = vrot.slane %v1569_v31, 4 }
 0x154   : > { %v758_v26 = vsel %vm739_vm1, %v400_v53, -inf  ;;  %v502_v9 = vsel %vm291_vm0, %v482_v40, %v501_v3  ;;  %v606_v17 = vperm.slane %v600_v1, %v1441_v59  ;;  %v755_v48 = vsel %vm739_vm1, %v398_v39, -inf }
 0x155   : > { %v394_v50 = vsel %vm291_vm0, %v374_v8, %v393_v15  ;;  %v500_v32 = vsel %vm291_vm0, %v499_v6, %v1494_v54  ;;  %v1654_v31 = vperm.slane %v702_v7, %v1441_v59  ;;  %v1657_v35 = vperm.slane %v590_v28, %v1441_v59 }
 0x156   : > { %v619_v34 = vrot.slane %v606_v17, 4  ;;  %v625_v3 = vrot.slane %v1612_v58, 4  ;;  %v737_v37 = vrot.slane %v698_v33, 4  ;;  %v601_v61 = vrot.slane %v550_v4, 4 }
 0x157   : > { %759 = vmax.xlane.f32.xlu1 %v758_v26  ;;  %756 = vmax.xlane.f32.xlu0 %v755_v48  ;;  %v767_v10 = vsel %vm739_vm1, %v502_v9, -inf  ;;  %v507_v24 = vrot.slane %v1636_v23, 4  ;;  %v478_v15 = vsel %vm291_vm0, %v1517_v0, %v477_v36  ;;  %v749_v54 = vsel %vm739_vm1, %v394_v50, -inf }
 0x158   : > { %v764_v8 = vsel %vm739_vm1, %v500_v32, -inf  ;;  %v1668_v43 = vsel %vm291_vm0, %v619_v34, %v1459_v16  ;;  %v712_v41 = vsel %vm291_vm0, %v711_v42, %v1539_v38  ;;  %v699_v45 = vrot.slane %v1597_v30, 4 }
 0x159   : > { %v395_v40 = vrot.slane %v1600_v55, 4  ;;  %v718_v51 = vperm.slane %v712_v41, %v1441_v59  ;;  %v730_v0 = vsel %vm291_vm0, %v1654_v31, %v729_v14  ;;  %v486_v25 = vperm.slane %v478_v15, %v1441_v59 }
 0x15a   : > { %v1679_v56 = vsel %vm739_vm1, %v730_v0, -inf  ;;  %v618_v16 = vsel %vm291_vm0, %v1657_v35, %v617_v22  ;;  %v602_v38 = vsel %vm291_vm0, %v1566_v27, %v601_v61  ;;  %v622_v2 = vsel %vm291_vm0, %v606_v17, %v621_v47 }
 0x15b   : > { %750 = vmax.xlane.f32.xlu2 %v749_v54  ;;  %v734_v30 = vsel %vm291_vm0, %v718_v51, %v733_v18  ;;  %v1689_v55 = vsel %vm739_vm1, %v618_v16, -inf  ;;  %v610_v63 = vperm.slane %v602_v38, %v1441_v59  ;;  %v1697_v4 = vsel %vm739_vm1, %v622_v2, -inf }
 0x15c   : > { %v1694_v14 = vsel %vm739_vm1, %v734_v30, -inf  ;;  %v731_v5 = vrot.slane %v718_v51, 4  ;;  %v722_v22 = vperm.slane %v1588_v20, %v1441_v59  ;;  %v396_v27 = vsel %vm291_vm0, %v395_v40, %v1455_v13 }
 0x15d   : > { %v700_v53 = vsel %vm291_vm0, %v699_v45, %v1582_v11  ;;  %v626_v6 = vsel %vm291_vm0, %v610_v63, %v625_v3  ;;  %v623_v47 = vrot.slane %v610_v63, 4  ;;  %v470_v36 = vperm.slane %v1486_v46, %v1441_v59 }
 0x15e   : > { %v1707_v39 = vsel %vm739_vm1, %v626_v6, -inf  ;;  %v732_v7 = vsel %vm291_vm0, %v731_v5, %v1604_v21  ;;  %v735_v18 = vrot.slane %v722_v22, 4  ;;  %v738_v20 = vsel %vm291_vm0, %v722_v22, %v737_v37 }
 0x15f   : > { %768 = vmax.xlane.f32.xlu1 %v767_v10  ;;  %765 = vmax.xlane.f32.xlu0 %v764_v8  ;;  %v1715_v13 = vsel %vm739_vm1, %v732_v7, -inf  ;;  %v624_v11 = vsel %vm291_vm0, %v623_v47, %v1612_v58  ;;  %v1720_v1 = vsel %vm739_vm1, %v738_v20, -inf  ;;  %v752_v28 = vsel %vm739_vm1, %v396_v27, -inf }
 0x160   : > { %v505_v42 = vrot.slane %v1501_v49, 4  ;;  %v736_v21 = vsel %vm291_vm0, %v735_v18, %v698_v33  ;;  %v806_v26 = vsel %vm739_vm1, %v624_v11, -inf  ;;  %v508_v46 = vsel %vm291_vm0, %v507_v24, %v470_v36 }
 0x161   : > { %v503_v9 = vrot.slane %v486_v25, 4  ;;  %v706_v17 = vperm.slane %v700_v53, %v1441_v59  ;;  %v830_v48 = vsel %vm739_vm1, %v736_v21, -inf  ;;  %v776_v50 = vsel %vm739_vm1, %v508_v46, -inf }
 0x162   : > { %v506_v58 = vsel %vm291_vm0, %v486_v25, %v505_v42  ;;  %v587_v3 = vrot.slane %v1607_v60, 4  ;;  %v511_v37 = vrot.slane %v1514_v19, 4  ;;  %v682_v61 = vperm.slane %v1394_v12, %v1441_v59 }
 0x163   : > { %753 = vmax.xlane.f32.xlu2 %v752_v28  ;;  %v773_v32 = vsel %vm739_vm1, %v506_v58, -inf  ;;  %v504_v33 = vsel %vm291_vm0, %v503_v9, %v1501_v49  ;;  %v723_v34 = vrot.slane %v706_v17, 4  ;;  %v509_v54 = vrot.slane %v470_v36, 4 }
 0x164   : > { %v770_v10 = vsel %vm739_vm1, %v504_v33, -inf  ;;  %v512_v15 = vsel %vm291_vm0, %v511_v37, %v1470_v29  ;;  %v588_v49 = vsel %vm291_vm0, %v587_v3, %v1544_v44  ;;  %v570_v19 = vperm.slane %v1364_v52, %v1441_v59 }
 0x165   : > { %v724_v24 = vsel %vm291_vm0, %v723_v34, %v682_v61  ;;  %v782_v8 = vsel %vm739_vm1, %v512_v15, -inf  ;;  %v510_v12 = vsel %vm291_vm0, %v1636_v23, %v509_v54  ;;  %v727_v41 = vrot.slane %v1654_v31, 4 }
 0x166   : > { %v812_v60 = vsel %vm739_vm1, %v724_v24, -inf  ;;  %v594_v45 = vperm.slane %v588_v49, %v1441_v59  ;;  %v779_v29 = vsel %vm739_vm1, %v510_v12, -inf  ;;  %v613_v44 = vrot.slane %v570_v19, 4 }
 0x167   : > { %777 = vmax.xlane.f32.xlu1 %v776_v50  ;;  %774 = vmax.xlane.f32.xlu0 %v773_v32  ;;  %v728_v40 = vsel %vm291_vm0, %v727_v41, %v1523_v57  ;;  %v615_v59 = vrot.slane %v1657_v35, 4  ;;  %v725_v57 = vrot.slane %v682_v61, 4  ;;  %v800_v38 = vsel %vm739_vm1, %v1668_v43, -inf }
 0x168   : > { %v611_v51 = vrot.slane %v594_v45, 4  ;;  %v614_v52 = vsel %vm291_vm0, %v594_v45, %v613_v44  ;;  %v818_v0 = vsel %vm739_vm1, %v728_v40, -inf }
 0x169   : > { %v791_v23 = vsel %vm739_vm1, %v614_v52, -inf  ;;  %v616_v16 = vsel %vm291_vm0, %v615_v59, %v1509_v62  ;;  %v726_v63 = vsel %vm291_vm0, %v706_v17, %v725_v57 }
 0x16a   : > { %v612_v31 = vsel %vm291_vm0, %v611_v51, %v570_v19  ;;  %v794_v30 = vsel %vm739_vm1, %v616_v16, -inf  ;;  %v815_v2 = vsel %vm739_vm1, %v726_v63, -inf }
 0x16b   : > { %771 = vmax.xlane.f32.xlu2 %v770_v10  ;;  %v788_v25 = vsel %vm739_vm1, %v612_v31, -inf }
 0x16f   : > { %813 = vmax.xlane.f32.xlu1 %v812_v60  ;;  %783 = vmax.xlane.f32.xlu0 %v782_v8 }
 0x173   : > { %780 = vmax.xlane.f32.xlu2 %v779_v29 }
 0x177   : > { %819 = vmax.xlane.f32.xlu1 %v818_v0  ;;  %792 = vmax.xlane.f32.xlu0 %v791_v23 }
 0x17b   : > { %789 = vmax.xlane.f32.xlu2 %v788_v25 }
 0x17f   : > { %801 = vmax.xlane.f32.xlu1 %v800_v38  ;;  %795 = vmax.xlane.f32.xlu0 %v794_v30 }
 0x183   : > { %816 = vmax.xlane.f32.xlu2 %v815_v2 }
 0x187   : > { %828 = vmax.xlane.f32.xlu1 %v1694_v14  ;;  %822 = vmax.xlane.f32.xlu0 %v1679_v56  ;;  %v868_v56 = vlaneseq }
 0x189   : > { %v1777_v27 = vand.u32 127, %v868_v56 }
 0x18b   : > { %798 = vmax.xlane.f32.xlu2 %v1689_v55 }
 0x18f   : > { %810 = vmax.xlane.f32.xlu1 %v1707_v39  ;;  %804 = vmax.xlane.f32.xlu0 %v1697_v4 }
 0x193   : > { %825 = vmax.xlane.f32.xlu2 %v1715_v13 }
 0x197   : > { %831 = vmax.xlane.f32.xlu0 %v830_v48 }
 0x19b   : > { %807 = vmax.xlane.f32.xlu2 %v806_v26 }
 0x1a3   : > { %834 = vmax.xlane.f32.xlu2 %v1720_v1 }
 0x1b8   : > { %v1775_v62 = vpop.xlane.xlu1 %786 }
 0x1b9   : > { %v885_v12 = vperm.slane %v1775_v62, %v1777_v27 }
 0x1be   : > { %v763_v35 = vpop.xlane.xlu2 %762 }
 0x1bf   : > { %v877_v26 = vperm.slane %v763_v35, %v1777_v27 }
 0x1c2   : > { %v748_v43 = vpop.xlane.xlu1 %747  ;;  %v745_v14 = vpop.xlane.xlu0 %744 }
 0x1c3   : > { %v871_v6 = vperm.slane %v745_v14, %v1777_v27  ;;  %v872_v20 = vperm.slane %v748_v43, %v1777_v27 }
 0x1c6   : > { %v742_v5 = vpop.xlane.xlu2 %741 }
 0x1c7   : > { %v870_v4 = vperm.slane %v742_v5, %v1777_v27 }
 0x1c9   : > { %v903_v7 = vsel %vm902_vm2, %v871_v6, %v870_v4 }
 0x1ca   : > { %v760_v22 = vpop.xlane.xlu1 %759  ;;  %v757_v55 = vpop.xlane.xlu0 %756  ;;  %v905_v13 = vsel %vm904_vm3, %v872_v20, %v903_v7 }
 0x1cb   : > { %v875_v1 = vperm.slane %v757_v55, %v1777_v27  ;;  %v876_v42 = vperm.slane %v760_v22, %v1777_v27 }
 0x1ce   : > { %v751_v53 = vpop.xlane.xlu2 %750 }
 0x1cf   : > { %v873_v18 = vperm.slane %v751_v53, %v1777_v27 }
 0x1d1   : > { %v907_v28 = vsel %vm906_vm4, %v873_v18, %v905_v13 }
 0x1d2   : > { %v769_v47 = vpop.xlane.xlu1 %768  ;;  %v766_v39 = vpop.xlane.xlu0 %765 }
 0x1d3   : > { %v879_v50 = vperm.slane %v769_v47, %v1777_v27  ;;  %v878_v32 = vperm.slane %v766_v39, %v1777_v27 }
 0x1d5   : > { %v916_v3 = vsel %vm902_vm2, %v879_v50, %v878_v32 }
 0x1d6   : > { %v754_v36 = vpop.xlane.xlu2 %753 }
 0x1d7   : > { %v874_v11 = vperm.slane %v754_v36, %v1777_v27 }
 0x1d9   : > { %v909_v21 = vsel %vm908_vm5, %v874_v11, %v907_v28 }
 0x1da   : > { %v911_v46 = vsel %vm910_vm6, %v875_v1, %v909_v21  ;;  %v778_v9 = vpop.xlane.xlu1 %777  ;;  %v775_v17 = vpop.xlane.xlu0 %774 }
 0x1db   : > { %v913_v48 = vsel %vm912_vm7, %v876_v42, %v911_v46  ;;  %v881_v61 = vperm.slane %v775_v17, %v1777_v27  ;;  %v882_v49 = vperm.slane %v778_v9, %v1777_v27 }
 0x1dc   : > { %v915_v58 = vsel %vm914_vm8, %v877_v26, %v913_v48 }
 0x1dd   : > { %942 = vst.msk [vmem:[%s1799_s12] sm:$0xff] %vm941_vm9, %v915_v58 }
 0x1de   : > { %v772_v33 = vpop.xlane.xlu2 %771 }
 0x1df   : > { %v880_v34 = vperm.slane %v772_v33, %v1777_v27 }
 0x1e1   : > { %v917_v37 = vsel %vm904_vm3, %v880_v34, %v916_v3 }
 0x1e2   : > { %v784_v10 = vpop.xlane.xlu0 %783  ;;  %v918_v24 = vsel %vm906_vm4, %v881_v61, %v917_v37  ;;  %v814_v15 = vpop.xlane.xlu1 %813 }
 0x1e3   : > { %v884_v19 = vperm.slane %v784_v10, %v1777_v27  ;;  %v919_v8 = vsel %vm908_vm5, %v882_v49, %v918_v24  ;;  %v894_v56 = vperm.slane %v814_v15, %v1777_v27 }
 0x1e6   : > { %v781_v54 = vpop.xlane.xlu2 %780 }
 0x1e7   : > { %v883_v60 = vperm.slane %v781_v54, %v1777_v27 }
 0x1e9   : > { %v920_v41 = vsel %vm910_vm6, %v883_v60, %v919_v8 }
 0x1ea   : > { %v921_v45 = vsel %vm912_vm7, %v884_v19, %v920_v41  ;;  %v793_v29 = vpop.xlane.xlu0 %792  ;;  %v820_v51 = vpop.xlane.xlu1 %819 }
 0x1eb   : > { %v922_v44 = vsel %vm914_vm8, %v885_v12, %v921_v45  ;;  %v887_v63 = vperm.slane %v793_v29, %v1777_v27  ;;  %v896_v7 = vperm.slane %v820_v51, %v1777_v27 }
 0x1ec   : > { %943 = vst.msk [vmem:[%s1799_s12 + $0x8] sm:$0xff] %vm941_vm9, %v922_v44 }
 0x1ee   : > { %v790_v40 = vpop.xlane.xlu2 %789 }
 0x1ef   : > { %v886_v16 = vperm.slane %v790_v40, %v1777_v27 }
 0x1f1   : > { %v923_v62 = vsel %vm902_vm2, %v887_v63, %v886_v16 }
 0x1f2   : > { %v796_v52 = vpop.xlane.xlu0 %795  ;;  %v802_v23 = vpop.xlane.xlu1 %801 }
 0x1f3   : > { %v888_v38 = vperm.slane %v796_v52, %v1777_v27  ;;  %v890_v22 = vperm.slane %v802_v23, %v1777_v27 }
 0x1f5   : > { %v924_v35 = vsel %vm904_vm3, %v888_v38, %v923_v62 }
 0x1f6   : > { %v817_v0 = vpop.xlane.xlu2 %816 }
 0x1f7   : > { %v895_v43 = vperm.slane %v817_v0, %v1777_v27 }
 0x1f9   : > { %v930_v4 = vsel %vm902_vm2, %v895_v43, %v894_v56 }
 0x1fa   : > { %v823_v31 = vpop.xlane.xlu0 %822  ;;  %v829_v25 = vpop.xlane.xlu1 %828  ;;  %v931_v1 = vsel %vm904_vm3, %v896_v7, %v930_v4 }
 0x1fb   : > { %v897_v6 = vperm.slane %v823_v31, %v1777_v27  ;;  %v899_v46 = vperm.slane %v829_v25, %v1777_v27 }
 0x1fd   : > { %v932_v42 = vsel %vm906_vm4, %v897_v6, %v931_v1 }
 0x1fe   : > { %v799_v59 = vpop.xlane.xlu2 %798 }
 0x1ff   : > { %v889_v2 = vperm.slane %v799_v59, %v1777_v27 }
 0x201   : > { %v925_v14 = vsel %vm906_vm4, %v889_v2, %v924_v35 }
 0x202   : > { %v805_v30 = vpop.xlane.xlu0 %804  ;;  %v811_v55 = vpop.xlane.xlu1 %810  ;;  %v926_v47 = vsel %vm908_vm5, %v890_v22, %v925_v14 }
 0x203   : > { %v891_v5 = vperm.slane %v805_v30, %v1777_v27  ;;  %v893_v18 = vperm.slane %v811_v55, %v1777_v27 }
 0x205   : > { %v927_v20 = vsel %vm910_vm6, %v891_v5, %v926_v47 }
 0x206   : > { %v826_v57 = vpop.xlane.xlu2 %825 }
 0x207   : > { %v898_v36 = vperm.slane %v826_v57, %v1777_v27 }
 0x209   : > { %v933_v21 = vsel %vm908_vm5, %v898_v36, %v932_v42 }
 0x20a   : > { %v832_v13 = vpop.xlane.xlu0 %831  ;;  %v934_v17 = vsel %vm910_vm6, %v899_v46, %v933_v21 }
 0x20b   : > { %v900_v26 = vperm.slane %v832_v13, %v1777_v27 }
 0x20d   : > { %v935_v58 = vsel %vm912_vm7, %v900_v26, %v934_v17 }
 0x20e   : > { %v808_v53 = vpop.xlane.xlu2 %807 }
 0x20f   : > { %v892_v39 = vperm.slane %v808_v53, %v1777_v27 }
 0x211   : > { %v928_v11 = vsel %vm912_vm7, %v892_v39, %v927_v20 }
 0x212   : > { %v929_v28 = vsel %vm914_vm8, %v893_v18, %v928_v11 }
 0x213   : > { %944 = vst.msk [vmem:[%s1799_s12 + $0x10] sm:$0xff] %vm941_vm9, %v929_v28 }
 0x216   : > { %v835_v9 = vpop.xlane.xlu2 %834 }
 0x217   : > { %v901_v48 = vperm.slane %v835_v9, %v1777_v27 }
 0x219   : > { %v936_v50 = vsel %vm914_vm8, %v901_v48, %v935_v58 }
 0x21a   : > { %945 = vst.msk [vmem:[%s1799_s12 + $0x18] sm:$0xff] %vm941_vm9, %v936_v50 }
 0x21b   : > { %1167 = shalt.err (!%p1164_p5)
}
 0x21c   : > { %s1230_s30 = smov 128   ;;  %s1231_s2 = smov 8  }
 0x21d   : > { %1073 = dma.vmem_to_hbm [thread:$0]  (%p1282_p4), %s963_s20, 512, %s965_s21, %s947_s22, %s1230_s30, %s1230_s30, %s1231_s2  }
 0x21e PF: > { %p1079_p6 = scmp.ge.s32.totalorder %s1218_s11, 2  ;;  %s979_s3 = sand.u32 1, %s1198_s6  }
 0x21f   : > { %s980_s4 = scalar_lea.sflag [#allocation3], %s979_s3 }
 0x220   : > { %p1076_p7 = pnand %p1079_p6, %p1289_p8 }
 0x222   : > { %p1077_p9 = pneg %p1076_p7 }
 0x224   : > { %1193 = dma.done.wait (%p1077_p9), %s980_s4, 512  }
 0x225   : > { %1195 = vsyncadd (%p1077_p9), %s980_s4, 4294966784  ;;  %s14_s11 = sadd.s32 1, %s1218_s11   ;;  %s1896_s6 = smov %s1202_s7 }
 0x226   : > { %p11_p10 = scmp.ge.s32.totalorder %s14_s11, 10   ;;  %s1897_s7 = smov %s1206_s8 }
 0x227   : > { %s1898_s8 = smov %s1295_s19  ;;  %s1899_s9 = smov %s1214_s10 }
 0x228   : > { %s1900_s10 = smov %s1902_s14  ;;  %13 = sbr.rel (!%p11_p10) target bundleno = 4 (0x4), region = 60 }
 0x22d   :  { %986 = vsyncpa [#allocation3], 1 }
 0x22e   :  { %988 = vsyncpa [#allocation3 + $0x1], 1 }

</bundles_post_ra>
